<compile_context>
chip_gen: v7x
topology: tpu7x:2x2x1
jax: 0.10.0
libtpu: 0.0.40
codegen_flags: <defaults>
</compile_context>

<pallas_src>
import functools

import jax
import jax.numpy as jnp
from jax.experimental import pallas as pl
from jax.experimental.pallas import tpu as pltpu

SCALE = 10.0
N_UNITS = 64
OUT_DIM = 1

_VMEM_BUDGET_BYTES = 24 << 20      # conservative for v7x's 32 MiB scoped default
_VMEM_LIMIT_BYTES = 32 << 20


def _round_up(n, m):
    return ((n + m - 1) // m) * m


def _chip_info():
    """Returns (is_v5e, num_tensorcores_per_device)."""
    try:
        kind = jax.devices()[0].device_kind.lower()
    except Exception:
        kind = ""
    is_v5e = ("v5 lite" in kind) or ("v5lite" in kind) or ("v5e" in kind)
    num_cores = 2 if "v7" in kind else 1       # v7x: 2 TCs share one device
    return is_v5e, num_cores


# ----------------------------------------------------------------------------
# Kernel: whole MLP hot path for one batch tile (4 MXU matmuls + 3 tanh passes).
# Activations are (features, tb): batch sits on the 128-lane axis, so x loads,
# all matmuls and the (1, tb) output store are lane-dense.
# ----------------------------------------------------------------------------
def _disc_kernel(xt_ref, w1_ref, b1_ref, w2_ref, b2_ref, w3_ref, b3_ref,
                 wo_ref, bo_ref, o_ref, *, act_dtype):
    x = xt_ref[...]                                   # (D_in, tb) f32; SCALE folded into w1

    # Layer 1: K = D_in (tiny) -> f32 operands. f32 accumulation + f32 bias-add,
    # then drop activations to act_dtype (bf16 on v6e/v7x -> EUP bf16 tanh).
    h = jnp.tanh((jnp.dot(w1_ref[...], x,
                          preferred_element_type=jnp.float32)
                  + b1_ref[...]).astype(act_dtype))

    # Layers 2/3: bf16 MXU operands (weights pre-cast offline), f32 accumulation,
    # f32 bias-add, activation in act_dtype (no-op cast before the dot when
    # act_dtype == weight dtype).
    h = jnp.tanh((jnp.dot(w2_ref[...], h.astype(w2_ref.dtype),
                          preferred_element_type=jnp.float32)
                  + b2_ref[...]).astype(act_dtype))
    h = jnp.tanh((jnp.dot(w3_ref[...], h.astype(w3_ref.dtype),
                          preferred_element_type=jnp.float32)
                  + b3_ref[...]).astype(act_dtype))

    # Output layer: (1, 64) @ (64, tb) with bf16 operands (halves MXU pushes);
    # f32 accumulation + bias, lane-dense (1, tb) store.
    o_ref[...] = (jnp.dot(wo_ref[...], h.astype(wo_ref.dtype),
                          preferred_element_type=jnp.float32) + bo_ref[...])


# ----------------------------------------------------------------------------
# Tile sizing
# ----------------------------------------------------------------------------
def _pick_tile(B, d_in, tb_max, num_cores):
    b128 = _round_up(max(int(B), 1), 128)
    tb = _round_up(max(int(tb_max), 128), 128)

    # VMEM budget guard (matters only for large D_in): double-buffered f32 x
    # tile + double-buffered f32 out tile + generous f32 intermediate allowance.
    per_col = 2 * d_in * 4 + 2 * 4 + 4 * N_UNITS * 4
    tb = min(tb, max(128, (_VMEM_BUDGET_BYTES // per_col) // 128 * 128))

    tb = min(tb, b128)

    # Multi-TensorCore devices (v7x): keep >= num_cores parallel grid steps so
    # the batch axis can be sharded across cores.
    if num_cores > 1 and b128 >= num_cores * 128:
        tb = min(tb, _round_up(-(-b128 // num_cores), 128))

    b_pad = _round_up(b128, tb)
    return tb, b_pad


# ----------------------------------------------------------------------------
# Wrappers
# ----------------------------------------------------------------------------
def discriminator_forward_cols(xt, kparams, *, tb_max=4096, act_dtype=None):
    """Column-layout entry point.  xt: (D_in, B) = x.T (SCALE not applied;
    it is folded into w1).  Returns (B, 1) f32."""
    D_in, B = xt.shape
    is_v5e, num_cores = _chip_info()
    if act_dtype is None:
        act_dtype = jnp.float32 if is_v5e else jnp.bfloat16

    tb, B_pad = _pick_tile(B, D_in, tb_max, num_cores)
    grid = B_pad // tb

    # Zero-pad the ragged batch tail on the lane axis (sliced off below).
    xt = jnp.pad(xt.astype(jnp.float32), ((0, 0), (0, B_pad - B)))

    w1, b1 = kparams["w1"], kparams["b1"]
    w2, b2 = kparams["w2"], kparams["b2"]
    w3, b3 = kparams["w3"], kparams["b3"]
    wo, bo = kparams["wo"], kparams["bo"]

    def full(a):   # small weights/biases: fully resident every grid step
        return pl.BlockSpec(a.shape, lambda i: (0, 0))

    kernel = functools.partial(_disc_kernel, act_dtype=act_dtype)

    out_t = pl.pallas_call(
        kernel,
        out_shape=jax.ShapeDtypeStruct((1, B_pad), jnp.float32),
        grid_spec=pltpu.PrefetchScalarGridSpec(
            num_scalar_prefetch=0,
            grid=(grid,),
            in_specs=[
                pl.BlockSpec((D_in, tb), lambda i: (0, i)),   # x tile, lane-dense
                full(w1), full(b1),
                full(w2), full(b2),
                full(w3), full(b3),
                full(wo), full(bo),
            ],
            out_specs=pl.BlockSpec((1, tb), lambda i: (0, i)),  # lane-dense store
        ),
        compiler_params=pltpu.CompilerParams(
            dimension_semantics=("parallel",),
            vmem_limit_bytes=_VMEM_LIMIT_BYTES),
    )(xt, w1, b1, w2, b2, w3, b3, wo, bo)

    return out_t[0, :B].reshape(B, OUT_DIM)


def discriminator_forward(x, kparams, *, tb_max=4096, act_dtype=None):
    """x: (B, D_in).  kparams: output of prepare_params().  Returns (B, 1) f32.
    The transpose + pad fuse into a single op under jit; prefer keeping x in
    (D_in, B) layout upstream and calling discriminator_forward_cols directly."""
    return discriminator_forward_cols(x.astype(jnp.float32).T, kparams,
                                      tb_max=tb_max, act_dtype=act_dtype)


# ----------------------------------------------------------------------------
# Parameters
# ----------------------------------------------------------------------------
def init_params(key, x_dim):
    """Torch-convention params: weight (out, in), bias (out,).
    Mimics nn.Linear's U(-1/sqrt(fan_in), 1/sqrt(fan_in)) init."""
    def linear(k, fan_in, fan_out):
        kw, kb = jax.random.split(k)
        lim = 1.0 / jnp.sqrt(jnp.float32(fan_in))
        w = jax.random.uniform(kw, (fan_out, fan_in), jnp.float32, -lim, lim)
        b = jax.random.uniform(kb, (fan_out,), jnp.float32, -lim, lim)
        return w, b

    k1, k2, k3, k4 = jax.random.split(key, 4)
    w1, b1 = linear(k1, x_dim, N_UNITS)
    w2, b2 = linear(k2, N_UNITS, N_UNITS)
    w3, b3 = linear(k3, N_UNITS, N_UNITS)
    wo, bo = linear(k4, N_UNITS, OUT_DIM)
    return dict(w1=w1, b1=b1, w2=w2, b2=b2, w3=w3, b3=b3, wo=wo, bo=bo)


def prepare_params(params, *, scale=SCALE, hidden_matmul_dtype=jnp.bfloat16):
    """One-time, offline repack into kernel layout:
       - SCALE folded into the first-layer weight (kept f32: folding + bf16
         would cost ~3 mantissa bits),
       - biases as (out, 1) columns (broadcast over the lane/batch axis),
       - hidden + output matmul weights pre-cast to bf16 (f32 to disable)."""
    return dict(
        w1=(scale * params["w1"]).astype(jnp.float32),
        b1=params["b1"].reshape(-1, 1).astype(jnp.float32),
        w2=params["w2"].astype(hidden_matmul_dtype),
        b2=params["b2"].reshape(-1, 1).astype(jnp.float32),
        w3=params["w3"].astype(hidden_matmul_dtype),
        b3=params["b3"].reshape(-1, 1).astype(jnp.float32),
        wo=params["wo"].astype(hidden_matmul_dtype),
        bo=params["bo"].reshape(-1, 1).astype(jnp.float32),
    )


# ----------------------------------------------------------------------------
# References
# ----------------------------------------------------------------------------
def _reference_forward_f32(x, p):
    """Exact torch-module semantics, f32 everywhere."""
    h = jnp.tanh((SCALE * x) @ p["w1"].T + p["b1"])
    h = jnp.tanh(h @ p["w2"].T + p["b2"])
    h = jnp.tanh(h @ p["w3"].T + p["b3"])
    return h @ p["wo"].T + p["bo"].reshape(1, -1)


def _reference_kernel_numerics(x, p, act_dtype, mm_dtype=jnp.bfloat16):
    """Same math with the kernel's dtype flow (bf16 matmul operands, act_dtype
    activations, f32 accumulation / bias-add)."""
    xs = SCALE * x.astype(jnp.float32)
    h = jnp.tanh((xs @ p["w1"].T + p["b1"]).astype(act_dtype))
    h = jnp.tanh((jnp.dot(h.astype(mm_dtype), p["w2"].astype(mm_dtype).T,
                          preferred_element_type=jnp.float32)
                  + p["b2"]).astype(act_dtype))
    h = jnp.tanh((jnp.dot(h.astype(mm_dtype), p["w3"].astype(mm_dtype).T,
                          preferred_element_type=jnp.float32)
                  + p["b3"]).astype(act_dtype))
    return (jnp.dot(h.astype(mm_dtype), p["wo"].astype(mm_dtype).T,
                    preferred_element_type=jnp.float32)
            + p["bo"].reshape(1, -1))


if __name__ == "__main__":
    key = jax.random.PRNGKey(0)
    k_params, k_x1, k_x2 = jax.random.split(key, 3)

    X_DIM = 4
    params = init_params(k_params, X_DIM)
    kparams = prepare_params(params)

    is_v5e, _ = _chip_info()
    act_dtype = jnp.float32 if is_v5e else jnp.bfloat16

    # Small case: batch pads to one 128-lane tile (grid = 1); jit fuses the
    # wrapper transpose+pad into a single op feeding the Pallas call.
    B1 = 8
    x1 = jax.random.normal(k_x1, (B1, X_DIM), jnp.float32)
    fwd = jax.jit(discriminator_forward)
    out1 = jax.block_until_ready(fwd(x1, kparams))
    assert out1.shape == (B1, OUT_DIM)
    assert jnp.allclose(out1, _reference_kernel_numerics(x1, params, act_dtype),
                        atol=2e-2, rtol=2e-2), "mismatch vs dtype-matched reference"
    assert jnp.allclose(out1, _reference_forward_f32(x1, params),
                        atol=6e-2, rtol=6e-2), "mismatch vs f32 module reference"

    # Multi-step grid case: exercises the parallel batch axis (grid = 2).
    B2 = 256
    x2 = jax.random.normal(k_x2, (B2, X_DIM), jnp.float32)
    out2 = jax.block_until_ready(discriminator_forward(x2, kparams, tb_max=128))
    assert out2.shape == (B2, OUT_DIM)
    assert jnp.allclose(out2, _reference_forward_f32(x2, params),
                        atol=6e-2, rtol=6e-2), "mismatch vs f32 module reference (B=256)"

    # Column-layout entry point (no wrapper transpose at all).
    out3 = jax.block_until_ready(
        discriminator_forward_cols(x2.T, kparams, tb_max=4096))
    assert jnp.allclose(out3, out2, atol=2e-2, rtol=2e-2)

    # Default reward_type='aim' -> wasserstein_reward(d) = d (identity).
    reward = out1

    print("KERNEL_OK")
</pallas_src>

<mosaic_0001>
module attributes {stable_mosaic.version = 11 : i64} {
  func.func @_disc_kernel(%arg0: i32, %arg1: memref<4x128xf32, #tpu.memory_space<vmem>>, %arg2: memref<64x4xf32, #tpu.memory_space<vmem>>, %arg3: memref<64x1xf32, #tpu.memory_space<vmem>>, %arg4: memref<64x64xbf16, #tpu.memory_space<vmem>>, %arg5: memref<64x1xf32, #tpu.memory_space<vmem>>, %arg6: memref<64x64xbf16, #tpu.memory_space<vmem>>, %arg7: memref<64x1xf32, #tpu.memory_space<vmem>>, %arg8: memref<1x64xbf16, #tpu.memory_space<vmem>>, %arg9: memref<1x1xf32, #tpu.memory_space<vmem>>, %arg10: memref<1x128xf32, #tpu.memory_space<vmem>>) attributes {dimension_semantics = [#tpu.dimension_semantics<parallel>], iteration_bounds = array<i64: 1>, scalar_prefetch = 0 : i64, scratch_operands = 0 : i64, tpu.core_type = #tpu.core_type<tc>, window_params = [{transform_indices = @transform_0, window_bounds = array<i64: 4, 128>}, {pipeline_mode = #tpu.pipeline_mode<synchronous>, transform_indices = @transform_1, window_bounds = array<i64: 64, 4>}, {pipeline_mode = #tpu.pipeline_mode<synchronous>, transform_indices = @transform_2, window_bounds = array<i64: 64, 1>}, {pipeline_mode = #tpu.pipeline_mode<synchronous>, transform_indices = @transform_3, window_bounds = array<i64: 64, 64>}, {pipeline_mode = #tpu.pipeline_mode<synchronous>, transform_indices = @transform_4, window_bounds = array<i64: 64, 1>}, {pipeline_mode = #tpu.pipeline_mode<synchronous>, transform_indices = @transform_5, window_bounds = array<i64: 64, 64>}, {pipeline_mode = #tpu.pipeline_mode<synchronous>, transform_indices = @transform_6, window_bounds = array<i64: 64, 1>}, {pipeline_mode = #tpu.pipeline_mode<synchronous>, transform_indices = @transform_7, window_bounds = array<i64: 1, 64>}, {pipeline_mode = #tpu.pipeline_mode<synchronous>, transform_indices = @transform_8, window_bounds = array<i64: 1, 1>}, {transform_indices = @transform_9, window_bounds = array<i64: 1, 128>}]} {
    %c0 = arith.constant 0 : index
    %c0_0 = arith.constant 0 : index
    %0 = vector.load %arg1[%c0, %c0_0] : memref<4x128xf32, #tpu.memory_space<vmem>>, vector<4x128xf32>
    %c0_1 = arith.constant 0 : index
    %c0_2 = arith.constant 0 : index
    %1 = vector.load %arg2[%c0_1, %c0_2] : memref<64x4xf32, #tpu.memory_space<vmem>>, vector<64x4xf32>
    %cst = arith.constant dense<0.000000e+00> : vector<64x128xf32>
    %2 = tpu.matmul %1, %0, %cst {dimension_numbers = #tpu.dot_dimension_numbers<[1], [0], [0], [1], [0, 0, 1, 1], [], []>} : vector<64x4xf32>, vector<4x128xf32>, vector<64x128xf32> -> vector<64x128xf32>
    %c0_3 = arith.constant 0 : index
    %c0_4 = arith.constant 0 : index
    %3 = vector.load %arg3[%c0_3, %c0_4] : memref<64x1xf32, #tpu.memory_space<vmem>>, vector<64x1xf32>
    %4 = vector.broadcast %3 : vector<64x1xf32> to vector<64x128xf32>
    %5 = arith.addf %2, %4 : vector<64x128xf32>
    %6 = arith.truncf %5 : vector<64x128xf32> to vector<64x128xbf16>
    %7 = math.tanh %6 : vector<64x128xbf16>
    %c0_5 = arith.constant 0 : index
    %c0_6 = arith.constant 0 : index
    %8 = vector.load %arg4[%c0_5, %c0_6] : memref<64x64xbf16, #tpu.memory_space<vmem>>, vector<64x64xbf16>
    %cst_7 = arith.constant dense<0.000000e+00> : vector<64x128xf32>
    %9 = tpu.matmul %8, %7, %cst_7 {dimension_numbers = #tpu.dot_dimension_numbers<[1], [0], [0], [1], [0, 0, 1, 1], [], []>} : vector<64x64xbf16>, vector<64x128xbf16>, vector<64x128xf32> -> vector<64x128xf32>
    %c0_8 = arith.constant 0 : index
    %c0_9 = arith.constant 0 : index
    %10 = vector.load %arg5[%c0_8, %c0_9] : memref<64x1xf32, #tpu.memory_space<vmem>>, vector<64x1xf32>
    %11 = vector.broadcast %10 : vector<64x1xf32> to vector<64x128xf32>
    %12 = arith.addf %9, %11 : vector<64x128xf32>
    %13 = arith.truncf %12 : vector<64x128xf32> to vector<64x128xbf16>
    %14 = math.tanh %13 : vector<64x128xbf16>
    %c0_10 = arith.constant 0 : index
    %c0_11 = arith.constant 0 : index
    %15 = vector.load %arg6[%c0_10, %c0_11] : memref<64x64xbf16, #tpu.memory_space<vmem>>, vector<64x64xbf16>
    %cst_12 = arith.constant dense<0.000000e+00> : vector<64x128xf32>
    %16 = tpu.matmul %15, %14, %cst_12 {dimension_numbers = #tpu.dot_dimension_numbers<[1], [0], [0], [1], [0, 0, 1, 1], [], []>} : vector<64x64xbf16>, vector<64x128xbf16>, vector<64x128xf32> -> vector<64x128xf32>
    %c0_13 = arith.constant 0 : index
    %c0_14 = arith.constant 0 : index
    %17 = vector.load %arg7[%c0_13, %c0_14] : memref<64x1xf32, #tpu.memory_space<vmem>>, vector<64x1xf32>
    %18 = vector.broadcast %17 : vector<64x1xf32> to vector<64x128xf32>
    %19 = arith.addf %16, %18 : vector<64x128xf32>
    %20 = arith.truncf %19 : vector<64x128xf32> to vector<64x128xbf16>
    %21 = math.tanh %20 : vector<64x128xbf16>
    %c0_15 = arith.constant 0 : index
    %c0_16 = arith.constant 0 : index
    %22 = vector.load %arg8[%c0_15, %c0_16] : memref<1x64xbf16, #tpu.memory_space<vmem>>, vector<1x64xbf16>
    %cst_17 = arith.constant dense<0.000000e+00> : vector<1x128xf32>
    %23 = tpu.matmul %22, %21, %cst_17 {dimension_numbers = #tpu.dot_dimension_numbers<[1], [0], [0], [1], [0, 0, 1, 1], [], []>} : vector<1x64xbf16>, vector<64x128xbf16>, vector<1x128xf32> -> vector<1x128xf32>
    %c0_18 = arith.constant 0 : index
    %c0_19 = arith.constant 0 : index
    %24 = vector.load %arg9[%c0_18, %c0_19] : memref<1x1xf32, #tpu.memory_space<vmem>>, vector<1x1xf32>
    %25 = vector.broadcast %24 : vector<1x1xf32> to vector<1x128xf32>
    %26 = arith.addf %23, %25 : vector<1x128xf32>
    %c0_20 = arith.constant 0 : index
    %c0_21 = arith.constant 0 : index
    %27 = vector.load %arg10[%c0_20, %c0_21] : memref<1x128xf32, #tpu.memory_space<vmem>>, vector<1x128xf32>
    tpu.vector_store %arg10[%c0_20, %c0_21], %26 {strides = array<i32>} : memref<1x128xf32, #tpu.memory_space<vmem>>, vector<1x128xf32>,
    return
  }
  func.func @transform_0(%arg0: i32) -> (i32, i32) {
    %c0_i32 = arith.constant 0 : i32
    %c0_i32_0 = arith.constant 0 : i32
    return %c0_i32, %arg0 : i32, i32
  }
  func.func @transform_1(%arg0: i32) -> (i32, i32) {
    %c0_i32 = arith.constant 0 : i32
    %c0_i32_0 = arith.constant 0 : i32
    %c0_i32_1 = arith.constant 0 : i32
    return %c0_i32, %c0_i32_0 : i32, i32
  }
  func.func @transform_2(%arg0: i32) -> (i32, i32) {
    %c0_i32 = arith.constant 0 : i32
    %c0_i32_0 = arith.constant 0 : i32
    %c0_i32_1 = arith.constant 0 : i32
    return %c0_i32, %c0_i32_0 : i32, i32
  }
  func.func @transform_3(%arg0: i32) -> (i32, i32) {
    %c0_i32 = arith.constant 0 : i32
    %c0_i32_0 = arith.constant 0 : i32
    %c0_i32_1 = arith.constant 0 : i32
    return %c0_i32, %c0_i32_0 : i32, i32
  }
  func.func @transform_4(%arg0: i32) -> (i32, i32) {
    %c0_i32 = arith.constant 0 : i32
    %c0_i32_0 = arith.constant 0 : i32
    %c0_i32_1 = arith.constant 0 : i32
    return %c0_i32, %c0_i32_0 : i32, i32
  }
  func.func @transform_5(%arg0: i32) -> (i32, i32) {
    %c0_i32 = arith.constant 0 : i32
    %c0_i32_0 = arith.constant 0 : i32
    %c0_i32_1 = arith.constant 0 : i32
    return %c0_i32, %c0_i32_0 : i32, i32
  }
  func.func @transform_6(%arg0: i32) -> (i32, i32) {
    %c0_i32 = arith.constant 0 : i32
    %c0_i32_0 = arith.constant 0 : i32
    %c0_i32_1 = arith.constant 0 : i32
    return %c0_i32, %c0_i32_0 : i32, i32
  }
  func.func @transform_7(%arg0: i32) -> (i32, i32) {
    %c0_i32 = arith.constant 0 : i32
    %c0_i32_0 = arith.constant 0 : i32
    %c0_i32_1 = arith.constant 0 : i32
    return %c0_i32, %c0_i32_0 : i32, i32
  }
  func.func @transform_8(%arg0: i32) -> (i32, i32) {
    %c0_i32 = arith.constant 0 : i32
    %c0_i32_0 = arith.constant 0 : i32
    %c0_i32_1 = arith.constant 0 : i32
    return %c0_i32, %c0_i32_0 : i32, i32
  }
  func.func @transform_9(%arg0: i32) -> (i32, i32) {
    %c0_i32 = arith.constant 0 : i32
    %c0_i32_0 = arith.constant 0 : i32
    return %c0_i32, %arg0 : i32, i32
  }
}

</mosaic_0001>

<bundles_post_ra>
// kernel: discriminator_forward.1
= control target key start
LH: loop header
LB: loop body
LE: loop exit
PB: predicated region body
PF: predicated region fallthrough
CT: control target
= control target key end

     0   :  { %vm117_vm0 = vcmask 1043456   ;;  %vm92_vm1 = vcmask 31744   ;;  %v767_v3 = vmov 0   ;;  %vm310_vm2 = vcmask 523264   ;;  %s971_s0 = inlined_call_operand.vmem [shape: f32[4,128], index: 0, kind: input, shape index: {}]   ;;  %s972_s1 = inlined_call_operand.vmem [shape: f32[64,4], index: 1, kind: input, shape index: {}]   ;;  %s973_s8 = inlined_call_operand.<no memory space> [shape: f32[1,1], index: 8, kind: input, shape index: {}]   ;;  %s974_s2 = inlined_call_operand.vmem [shape: f32[64,1], index: 2, kind: input, shape index: {}]   ;;  %s975_s4 = inlined_call_operand.vmem [shape: f32[64,1], index: 4, kind: input, shape index: {}]   ;;  %s976_s6 = inlined_call_operand.vmem [shape: f32[64,1], index: 6, kind: input, shape index: {}]   ;;  %s977_s3 = inlined_call_operand.vmem [shape: bf16[64,64], index: 3, kind: input, shape index: {}]   ;;  %s978_s5 = inlined_call_operand.vmem [shape: bf16[64,64], index: 5, kind: input, shape index: {}]   ;;  %s979_s7 = inlined_call_operand.vmem [shape: bf16[1,64], index: 7, kind: input, shape index: {}]   ;;  %s980_s9 = inlined_call_operand.vmem [shape: f32[1,128], index: 9, kind: output, shape index: {}]  }
   0x1   :  { %v35_v0 = vld [vmem:[%s971_s0] sm:$0xf]  ;;  %v37_v2 = vld [vmem:[%s972_s1 + $0x8] sm:$0xff]  ;;  %733 = vset.pattern.permute.xlu0 %v767_v3  ;;  %734 = vset.pattern.permute.xlu1 %v767_v3  ;;  %v14_v4 = vstv %s973_s8  ;;  %v38_v5 = vld [vmem:[%s972_s1 + $0x10] sm:$0xff]  ;;  %vm769_vm3 = vmmov 0  }
   0x2   :  { %v36_v1 = vld [vmem:[%s972_s1] sm:$0xff]  ;;  %672 = vmatprep.subr.msk.mxu0 %vm117_vm0, %v35_v0  ;;  %15 = vst [vmem:[#allocation2] sm:$0x1] %v14_v4  ;;  %v46_v7 = vld [vmem:[%s974_s2 + $0x10] sm:$0xff]  ;;  %v39_v8 = vld [vmem:[%s972_s1 + $0x18] sm:$0xff] }
   0x3   :  { %674 = vmatprep.mubr.msk.f32.mxu0 %vm92_vm1, %v36_v1  ;;  %673 = vmatpush3.msk.msra.mxu0 %vm117_vm0, %v35_v0  ;;  %v44_v6 = vld [vmem:[%s974_s2] sm:$0xff]  ;;  %v45_v10 = vld [vmem:[%s974_s2 + $0x8] sm:$0xff]  ;;  %v47_v11 = vld [vmem:[%s974_s2 + $0x18] sm:$0xff] }
   0x4   :  { %675 = vmatmul.mubr.msk.f32.vlgmr.msra.gmra.mrb[0].mxu0 %vm92_vm1, %v37_v2  ;;  %54 = vperm.xlu0 %733, %v44_v6   ;;  %v40_v9 = vld [vmem:[%s972_s1 + $0x20] sm:$0xff]  ;;  %v41_v12 = vld [vmem:[%s972_s1 + $0x28] sm:$0xff]  ;;  %v42_v13 = vld [vmem:[%s972_s1 + $0x30] sm:$0xff] }
   0x5   :  { %677 = vmatprep.mubr.msk.f32.mxu0 %vm92_vm1, %v38_v5  ;;  %64 = vperm.xlu1 %734, %v46_v7   ;;  %v48_v14 = vld [vmem:[%s974_s2 + $0x20] sm:$0xff]  ;;  %v49_v15 = vld [vmem:[%s974_s2 + $0x28] sm:$0xff]  ;;  %v43_v16 = vld [vmem:[%s972_s1 + $0x38] sm:$0xff] }
   0x6   :  { %v50_v17 = vld [vmem:[%s974_s2 + $0x30] sm:$0xff]  ;;  %v51_v18 = vld [vmem:[%s974_s2 + $0x38] sm:$0xff]  ;;  %v242_v19 = vld [vmem:[%s975_s4] sm:$0xff] }
   0x7   :  { %v243_v20 = vld [vmem:[%s975_s4 + $0x8] sm:$0xff]  ;;  %v244_v21 = vld [vmem:[%s975_s4 + $0x10] sm:$0xff]  ;;  %v245_v22 = vld [vmem:[%s975_s4 + $0x18] sm:$0xff] }
   0x8   :  { %678 = vmatmul.mubr.msk.f32.gmra.mrb[2].mxu0 %vm92_vm1, %v39_v8  ;;  %59 = vperm.xlu0 %733, %v45_v10   ;;  %v246_v23 = vld [vmem:[%s975_s4 + $0x20] sm:$0xff]  ;;  %v247_v24 = vld [vmem:[%s975_s4 + $0x28] sm:$0xff]  ;;  %v248_v25 = vld [vmem:[%s975_s4 + $0x30] sm:$0xff] }
   0x9   :  { %680 = vmatprep.mubr.msk.f32.mxu0 %vm92_vm1, %v40_v9  ;;  %69 = vperm.xlu1 %734, %v47_v11   ;;  %v249_v26 = vld [vmem:[%s975_s4 + $0x38] sm:$0xff]  ;;  %v404_v27 = vld [vmem:[%s976_s6] sm:$0xff]  ;;  %v405_v28 = vld [vmem:[%s976_s6 + $0x8] sm:$0xff] }
   0xa   :  { %v406_v29 = vld [vmem:[%s976_s6 + $0x10] sm:$0xff]  ;;  %v407_v30 = vld [vmem:[%s976_s6 + $0x18] sm:$0xff]  ;;  %v408_v31 = vld [vmem:[%s976_s6 + $0x20] sm:$0xff] }
   0xb   :  { %v409_v32 = vld [vmem:[%s976_s6 + $0x28] sm:$0xff]  ;;  %v410_v33 = vld [vmem:[%s976_s6 + $0x30] sm:$0xff]  ;;  %v411_v34 = vld [vmem:[%s976_s6 + $0x38] sm:$0xff] }
   0xc   :  { %681 = vmatmul.mubr.msk.f32.gmra.mrb[4].mxu0 %vm92_vm1, %v41_v12  ;;  %74 = vperm.xlu0 %733, %v48_v14   ;;  %v558_v35 = vld [vmem:[#allocation2] sm:$0x1]  ;;  %v736_v5 = vld [vmem:[%s977_s3 + $0x8] sm:$0xff]   ;;  %v737_v6 = vld [vmem:[%s977_s3 + $0x10] sm:$0xff]  }
   0xd   :  { %683 = vmatprep.mubr.msk.f32.mxu0 %vm92_vm1, %v42_v13  ;;  %79 = vperm.xlu1 %734, %v49_v15   ;;  %v735_v36 = vld [vmem:[%s977_s3] sm:$0xff]   ;;  %v738_v7 = vld [vmem:[%s977_s3 + $0x18] sm:$0xff]  }
   0xe   :  { %694 = vmatprep.mubr.msk.bf16.mxu1 %vm310_vm2, %v735_v36  ;;  %v739_v8 = vld [vmem:[%s978_s5] sm:$0xff]  }
  0x10   :  { %684 = vmatmul.mubr.msk.f32.gmra.mrb[6].mxu0 %vm92_vm1, %v43_v16  ;;  %84 = vperm.xlu0 %733, %v50_v17  }
  0x11   :  { %89 = vperm.xlu1 %734, %v51_v18   ;;  %710 = vmatprep.mubr.msk.bf16.mxu0 %vm310_vm2, %v739_v8 }
  0x14   :  { %252 = vperm.xlu0 %733, %v242_v19  }
  0x15   :  { %257 = vperm.xlu1 %734, %v243_v20  }
  0x18   :  { %262 = vperm.xlu0 %733, %v244_v21  }
  0x19   :  { %267 = vperm.xlu1 %734, %v245_v22  }
  0x1c   :  { %272 = vperm.xlu0 %733, %v246_v23  }
  0x1d   :  { %277 = vperm.xlu1 %734, %v247_v24  }
  0x20   :  { %282 = vperm.xlu0 %733, %v248_v25  }
  0x21   :  { %287 = vperm.xlu1 %734, %v249_v26  }
  0x24   :  { %414 = vperm.xlu0 %733, %v404_v27  }
  0x25   :  { %419 = vperm.xlu1 %734, %v405_v28  }
  0x28   :  { %424 = vperm.xlu0 %733, %v406_v29  }
  0x29   :  { %429 = vperm.xlu1 %734, %v407_v30  }
  0x2c   :  { %434 = vperm.xlu0 %733, %v408_v31  }
  0x2d   :  { %439 = vperm.xlu1 %734, %v409_v32  }
  0x30   :  { %444 = vperm.xlu0 %733, %v410_v33  }
  0x31   :  { %449 = vperm.xlu1 %734, %v411_v34  }
  0x34   :  { %561 = vperm.xlu0 %733, %v558_v35  }
  0x83   :  { %v55_v37 = vpop.permute.xlu0 %54 }
  0x84   :  { %v65_v38 = vpop.permute.xlu1 %64 }
  0x87   :  { %v60_v39 = vpop.permute.xlu0 %59 }
  0x88   :  { %v70_v40 = vpop.permute.xlu1 %69 }
  0x8b   :  { %v75_v51 = vpop.permute.xlu0 %74 }
  0x8c   :  { %v80_v49 = vpop.permute.xlu1 %79 }
  0x8f   :  { %v85_v60 = vpop.permute.xlu0 %84 }
  0x90   :  { %v90_v57 = vpop.permute.xlu1 %89 }
  0x93   :  { %v253_v9 = vpop.permute.xlu0 %252 }
  0x94   :  { %v258_v10 = vpop.permute.xlu1 %257 }
  0x97   :  { %v263_v11 = vpop.permute.xlu0 %262 }
  0x98   :  { %v268_v12 = vpop.permute.xlu1 %267 }
  0x9b   :  { %v273_v16 = vpop.permute.xlu0 %272 }
  0x9c   :  { %v278_v20 = vpop.permute.xlu1 %277 }
  0x9f   :  { %v283_v26 = vpop.permute.xlu0 %282 }
  0xa0   :  { %v288_v28 = vpop.permute.xlu1 %287 }
  0xd7   :  { %v676_v41 = vpop.f32.mrb[0].mxu0 }
  0xd8   :  { %v193_v42 = vadd.f32 %v676_v41, %v60_v39  ;;  %v187_v43 = vpop.f32.mrb[1].mxu0  ;;  %v740_v41 = vld [vmem:[%s978_s5 + $0x8] sm:$0xff]  }
  0xd9   :  { %v188_v44 = vadd.f32 %v187_v43, %v55_v37  ;;  %v742_v43 = vld [vmem:[%s978_s5 + $0x18] sm:$0xff]  }
  0xdb   :  { %v226_v45 = vpack.c.bf16 %v193_v42, %v188_v44  ;;  %v679_v46 = vpop.f32.mrb[2].mxu0  ;;  %v741_v42 = vld [vmem:[%s978_s5 + $0x10] sm:$0xff]   ;;  %v768_v44 = vmov 0.0  }
  0xdc   :  { %v203_v47 = vadd.f32 %v679_v46, %v70_v40  ;;  %v197_v48 = vpop.f32.mrb[3].mxu0  ;;  %v420_v46 = vpop.permute.xlu1 %419 }
  0xdd   :  { %743 = vtanh.bf16 %v226_v45  ;;  %v198_v50 = vadd.f32 %v197_v48, %v65_v38  ;;  %v415_v45 = vpop.permute.xlu0 %414 }
  0xdf   :  { %v227_v52 = vpack.c.bf16 %v203_v47, %v198_v50  ;;  %v682_v53 = vpop.f32.mrb[4].mxu0 }
  0xe0   :  { %v213_v54 = vadd.f32 %v682_v53, %v80_v49  ;;  %v207_v55 = vpop.f32.mrb[5].mxu0  ;;  %v430_v48 = vpop.permute.xlu1 %429 }
  0xe1   :  { %745 = vtanh.bf16 %v227_v52  ;;  %v208_v56 = vadd.f32 %v207_v55, %v75_v51  ;;  %v425_v47 = vpop.permute.xlu0 %424 }
  0xe3   :  { %v228_v58 = vpack.c.bf16 %v213_v54, %v208_v56  ;;  %v685_v59 = vpop.f32.mrb[6].mxu0 }
  0xe4   :  { %v223_v61 = vadd.f32 %v685_v59, %v90_v57  ;;  %v217_v62 = vpop.f32.mrb[7].mxu0  ;;  %v440_v56 = vpop.permute.xlu1 %439 }
  0xe5   :  { %747 = vtanh.bf16 %v228_v58  ;;  %v218_v63 = vadd.f32 %v217_v62, %v85_v60  ;;  %v435_v52 = vpop.permute.xlu0 %434 }
  0xe7   :  { %v229_v0 = vpack.c.bf16 %v223_v61, %v218_v63 }
  0xe8   :  { %v744_v1 = vpop.eup %743 }
  0xe9   :  { %749 = vtanh.bf16 %v229_v0  ;;  %686 = vmatprep.subr.bf16.mxu1 %v744_v1  ;;  %v445_v62 = vpop.permute.xlu0 %444  ;;  %v450_v0 = vpop.permute.xlu1 %449 }
  0xea   :  { %687 = vmatpush3.bf16.msra.mxu1 %v744_v1 }
  0xec   :  { %v746_v2 = vpop.eup %745 }
  0xed   :  { %688 = vmatprep.subr.bf16.mxu1 %v746_v2 }
  0xee   :  { %689 = vmatpush3.bf16.msra.mxu1 %v746_v2 }
  0xf0   :  { %v748_v3 = vpop.eup %747 }
  0xf1   :  { %690 = vmatprep.subr.bf16.mxu1 %v748_v3 }
  0xf2   :  { %691 = vmatpush3.bf16.msra.mxu1 %v748_v3 }
  0xf4   :  { %v750_v4 = vpop.eup %749 }
  0xf5   :  { %692 = vmatprep.subr.bf16.mxu1 %v750_v4 }
  0xf6   :  { %693 = vmatpush3.bf16.msra.mxu1 %v750_v4 }
  0xf7   :  { %718 = vmatprep.subr.bf16.mxu1 %v768_v44 }
  0xf9   :  { %695 = vmatmul.mubr.msk.bf16.vlgmr.msra.gmra.mrb[0].mxu1 %vm310_vm2, %v736_v5 }
  0xfa   :  { %698 = vmatprep.mubr.msk.bf16.mxu1 %vm310_vm2, %v737_v6 }
 0x101   :  { %699 = vmatmul.mubr.msk.bf16.gmra.mrb[4].mxu1 %vm310_vm2, %v738_v7 }
 0x102   :  { %726 = vmatprep.mubr.msk.bf16.mxu1 %vm769_vm3, %v768_v44 }
 0x1cc   :  { %v696_v13 = vpop.f32.mrb[0].mxu1 }
 0x1cd   :  { %v357_v14 = vpop.f32.mrb[1].mxu1  ;;  %v366_v17 = vadd.f32 %v696_v13, %v263_v11  ;;  %v557_v13 = vld [vmem:[%s979_s7] sm:$0x1] }
 0x1ce   :  { %v697_v15 = vpop.f32.mrb[2].mxu1  ;;  %v358_v21 = vadd.f32 %v357_v14, %v253_v9  ;;  %v564_v14 = vlaneseq }
 0x1cf   :  { %v369_v18 = vadd.f32 %v697_v15, %v268_v12  ;;  %v360_v19 = vpop.f32.mrb[3].mxu1 }
 0x1d0   :  { %v361_v22 = vadd.f32 %v360_v19, %v258_v10  ;;  %v565_v15 = vshrl.u32 %v564_v14, 7 }
 0x1d1   :  { %v389_v23 = vpack.c.bf16 %v369_v18, %v366_v17  ;;  %v562_v17 = vpop.permute.xlu0 %561 }
 0x1d2   :  { %v388_v24 = vpack.c.bf16 %v361_v22, %v358_v21 }
 0x1d4   :  { %751 = vtanh.bf16 %v388_v24  ;;  %v700_v25 = vpop.f32.mrb[4].mxu1 }
 0x1d5   :  { %v373_v27 = vpop.f32.mrb[5].mxu1  ;;  %753 = vtanh.bf16 %v389_v23  ;;  %v382_v30 = vadd.f32 %v700_v25, %v283_v26 }
 0x1d6   :  { %v701_v29 = vpop.f32.mrb[6].mxu1  ;;  %v374_v33 = vadd.f32 %v373_v27, %v273_v16  ;;  %v566_v16 = vsub.s32 0, %v565_v15 }
 0x1d7   :  { %v385_v31 = vadd.f32 %v701_v29, %v288_v28  ;;  %v376_v32 = vpop.f32.mrb[7].mxu1 }
 0x1d8   :  { %v377_v34 = vadd.f32 %v376_v32, %v278_v20  ;;  %v567_v18 = vrot.slane %v562_v17, %v566_v16 }
 0x1d9   :  { %v391_v35 = vpack.c.bf16 %v385_v31, %v382_v30 }
 0x1da   :  { %v390_v36 = vpack.c.bf16 %v377_v34, %v374_v33 }
 0x1dc   :  { %755 = vtanh.bf16 %v390_v36 }
 0x1dd   :  { %757 = vtanh.bf16 %v391_v35 }
 0x1df   :  { %v752_v37 = vpop.eup %751 }
 0x1e0   :  { %702 = vmatprep.subr.bf16.mxu0 %v752_v37  ;;  %v754_v38 = vpop.eup %753 }
 0x1e1   :  { %703 = vmatpush3.bf16.msra.mxu0 %v752_v37 }
 0x1e2   :  { %704 = vmatprep.subr.bf16.mxu0 %v754_v38 }
 0x1e5   :  { %705 = vmatpush3.bf16.msra.mxu0 %v754_v38 }
 0x1e7   :  { %v756_v39 = vpop.eup %755 }
 0x1e8   :  { %706 = vmatprep.subr.bf16.mxu0 %v756_v39  ;;  %v758_v40 = vpop.eup %757 }
 0x1e9   :  { %707 = vmatpush3.bf16.msra.mxu0 %v756_v39 }
 0x1ea   :  { %708 = vmatprep.subr.bf16.mxu0 %v758_v40 }
 0x1ed   :  { %709 = vmatpush3.bf16.msra.mxu0 %v758_v40 }
 0x1f0   :  { %711 = vmatmul.mubr.msk.bf16.vlgmr.msra.gmra.mrb[8].mxu0 %vm310_vm2, %v740_v41 }
 0x1f1   :  { %714 = vmatprep.mubr.msk.bf16.mxu0 %vm310_vm2, %v741_v42 }
 0x1f8   :  { %715 = vmatmul.mubr.msk.bf16.gmra.mrb[12].mxu0 %vm310_vm2, %v742_v43 }
 0x2c3   :  { %v712_v49 = vpop.f32.mrb[8].mxu0 }
 0x2c4   :  { %v518_v50 = vpop.f32.mrb[9].mxu0  ;;  %v527_v53 = vadd.f32 %v712_v49, %v425_v47 }
 0x2c5   :  { %v713_v51 = vpop.f32.mrb[10].mxu0  ;;  %v519_v57 = vadd.f32 %v518_v50, %v415_v45 }
 0x2c6   :  { %v530_v54 = vadd.f32 %v713_v51, %v430_v48  ;;  %v521_v55 = vpop.f32.mrb[11].mxu0 }
 0x2c7   :  { %v522_v58 = vadd.f32 %v521_v55, %v420_v46 }
 0x2c8   :  { %v550_v59 = vpack.c.bf16 %v530_v54, %v527_v53 }
 0x2c9   :  { %v549_v60 = vpack.c.bf16 %v522_v58, %v519_v57 }
 0x2cb   :  { %759 = vtanh.bf16 %v549_v60  ;;  %v716_v61 = vpop.f32.mrb[12].mxu0 }
 0x2cc   :  { %v534_v63 = vpop.f32.mrb[13].mxu0  ;;  %v543_v2 = vadd.f32 %v716_v61, %v445_v62  ;;  %761 = vtanh.bf16 %v550_v59 }
 0x2cd   :  { %v717_v1 = vpop.f32.mrb[14].mxu0  ;;  %v535_v5 = vadd.f32 %v534_v63, %v435_v52 }
 0x2ce   :  { %v546_v3 = vadd.f32 %v717_v1, %v450_v0  ;;  %v537_v4 = vpop.f32.mrb[15].mxu0 }
 0x2cf   :  { %v538_v6 = vadd.f32 %v537_v4, %v440_v56 }
 0x2d0   :  { %v552_v7 = vpack.c.bf16 %v546_v3, %v543_v2 }
 0x2d1   :  { %v551_v8 = vpack.c.bf16 %v538_v6, %v535_v5 }
 0x2d3   :  { %763 = vtanh.bf16 %v551_v8 }
 0x2d4   :  { %765 = vtanh.bf16 %v552_v7 }
 0x2d6   :  { %v760_v9 = vpop.eup %759 }
 0x2d7   :  { %719 = vmatpush3.bf16.msra.mxu1 %v760_v9  ;;  %v762_v10 = vpop.eup %761 }
 0x2d8   :  { %720 = vmatprep.subr.bf16.mxu1 %v768_v44 }
 0x2db   :  { %721 = vmatpush3.bf16.msra.mxu1 %v762_v10 }
 0x2dc   :  { %722 = vmatprep.subr.bf16.mxu1 %v768_v44 }
 0x2de   :  { %v764_v11 = vpop.eup %763 }
 0x2df   :  { %723 = vmatpush3.bf16.msra.mxu1 %v764_v11  ;;  %v766_v12 = vpop.eup %765 }
 0x2e0   :  { %724 = vmatprep.subr.bf16.mxu1 %v768_v44 }
 0x2e3   :  { %725 = vmatpush3.bf16.msra.mxu1 %v766_v12 }
 0x2e6   :  { %727 = vmatmul.mubr.msk.bf16.vlgmr.msra.gmra.mrb[8].mxu1 %vm310_vm2, %v557_v13 }
 0x3b9   :  { %v605_v19 = vpop.f32.mrb[8].mxu1 }
 0x3ba   :  { %v606_v20 = vadd.f32 %v605_v19, %v567_v18  ;;  %v728_v21 = vpop.f32.mrb[9].mxu1 }
 0x3bb   :  { %v608_v22 = vpop.f32.mrb[10].mxu1 }
 0x3bc   :  { %611 = vst [vmem:[%s980_s9] sm:$0x1] %v606_v20  ;;  %v729_v23 = vpop.f32.mrb[11].mxu1 }

</bundles_post_ra>
